<compile_context>
chip_gen: v7x
topology: tpu7x:2x2x1
jax: 0.10.0
libtpu: 0.0.40
codegen_flags: <defaults>
</compile_context>

<pallas_src>
import functools

import jax
import jax.numpy as jnp
from jax.experimental import pallas as pl
from jax.experimental.pallas import tpu as pltpu


def _round_up(v, m):
    return ((v + m - 1) // m) * m


@functools.lru_cache(maxsize=None)
def _vmem_limit_bytes():
    """Generation-aware scoped-VMEM limit.

    v5e/v6e have 128 MiB VMEM -> allow ~100 MiB; v7x has 64 MiB -> cap at
    48 MiB.  Falls back to the conservative 32 MiB default if the query is
    unavailable.
    """
    try:
        cap = int(pltpu.get_tpu_info().vmem_capacity_bytes)
    except Exception:
        return 32 * 1024 * 1024
    if cap >= 96 * 1024 * 1024:
        return 100 * 1024 * 1024
    return 48 * 1024 * 1024


def _pick_tiles(m, k, n):
    # MXU-bound tiles: a 512x512x1024 bf16 step is ~0.5 GFLOP vs ~0.35us grid
    # step overhead; double buffered footprint is ~10 MiB (fits v7x scoped
    # VMEM).  tm is a multiple of 16 (bf16 packs 16 sublanes per vreg),
    # tk/tn are multiples of 128 (lane axis).
    tm = min(_round_up(m, 16), 512)
    tk = min(_round_up(k, 128), 1024)
    tn = min(_round_up(n, 128), 512)
    return tm, tk, tn


def _pick_mse_tiles(m, n):
    # MSE is purely memory-bound: large lane-dense f32 tiles.
    tm = min(_round_up(m, 8), 512)
    tn = min(_round_up(n, 128), 1024)
    return tm, tn


def _pad2d(a, row_mult, col_mult):
    r, c = a.shape
    pr = (-r) % row_mult
    pc = (-c) % col_mult
    if pr or pc:
        a = jnp.pad(a, ((0, pr), (0, pc)))
    return a


def prepare_params(w, b):
    """Cast + pad parameters once (amortized at build time).

    Removes the per-call K*N cast/pad pass over W (extra HBM read+write and
    an extra dispatch before the kernel).  The wrappers' re-pad/re-cast is a
    no-op for arrays returned by this function.
    """
    k, n = w.shape
    _, tk, tn = _pick_tiles(16, k, n)
    wp = _pad2d(jnp.asarray(w, jnp.bfloat16), tk, tn)
    bp = _pad2d(jnp.asarray(b, jnp.float32).reshape(1, -1), 1, tn)
    return wp, bp


# --------------------------------------------------------------------------
# Shared helper: per-block partial sum of squares with edge-only masking.
# --------------------------------------------------------------------------
def _partial_sq_sum(part_ref, d, i, j, *, m, n, tm, tn, mask_rows, mask_cols):
    conds = []
    if mask_rows:
        conds.append((i + 1) * tm > m)
    if mask_cols:
        conds.append((j + 1) * tn > n)

    if not conds:  # no padding at all -> never mask
        part_ref[0, 0] = jnp.sum(d * d)
        return

    edge = conds[0]
    for c in conds[1:]:
        edge = jnp.logical_or(edge, c)

    @pl.when(edge)
    def _():
        row = jax.lax.broadcasted_iota(jnp.int32, (tm, tn), 0) + i * tm
        col = jax.lax.broadcasted_iota(jnp.int32, (tm, tn), 1) + j * tn
        dm = jnp.where((row < m) & (col < n), d, 0.0)
        part_ref[0, 0] = jnp.sum(dm * dm)

    @pl.when(jnp.logical_not(edge))
    def _():
        part_ref[0, 0] = jnp.sum(d * d)


# --------------------------------------------------------------------------
# Kernel 1: fused dense forward + MSE partial sums
#   pred = x @ W + b (bf16 MXU, f32 acc); per-(i,j) partial sum-of-squares.
# --------------------------------------------------------------------------
def _fused_body(x_ref, w_ref, b_ref, t_ref, o_ref, part_ref, acc_ref,
                *, m, n, tm, tn, mask_rows, mask_cols):
    i = pl.program_id(0)
    j = pl.program_id(1)
    k = pl.program_id(2)

    @pl.when(k == 0)
    def _():
        acc_ref[...] = jnp.zeros_like(acc_ref)

    acc_ref[...] += jnp.dot(x_ref[...], w_ref[...],
                            preferred_element_type=jnp.float32)

    @pl.when(k == pl.num_programs(2) - 1)
    def _():
        pred = acc_ref[...] + b_ref[...]               # f32 (tm, tn)
        if o_ref is not None:
            o_ref[...] = pred.astype(o_ref.dtype)
        d = pred - t_ref[...]
        _partial_sq_sum(part_ref, d, i, j, m=m, n=n, tm=tm, tn=tn,
                        mask_rows=mask_rows, mask_cols=mask_cols)


def _fused_pred_loss_kernel(x_ref, w_ref, b_ref, t_ref, o_ref, part_ref,
                            acc_ref, **kw):
    _fused_body(x_ref, w_ref, b_ref, t_ref, o_ref, part_ref, acc_ref, **kw)


def _fused_loss_only_kernel(x_ref, w_ref, b_ref, t_ref, part_ref, acc_ref,
                            **kw):
    _fused_body(x_ref, w_ref, b_ref, t_ref, None, part_ref, acc_ref, **kw)


def forward_with_loss(x, w, b, target, *, tiles=None, return_pred=True,
                      out_dtype=jnp.float32):
    """Single pallas_call: pred never makes an extra HBM round trip.

    Loss is emitted as one partial per (i, j) block (SMEM), so i/j can be
    "parallel" (v7x megacore); the (grid_i, grid_j) partials are reduced
    outside.  With return_pred=False the pred writeback is skipped entirely.
    """
    m, k_dim = x.shape
    n = target.shape[1]
    tm, tk, tn = tiles if tiles is not None else _pick_tiles(m, k_dim, n)

    xp = _pad2d(jnp.asarray(x, jnp.bfloat16), tm, tk)
    wp = _pad2d(jnp.asarray(w, jnp.bfloat16), tk, tn)   # no-op if prepared
    bp = _pad2d(jnp.asarray(b, jnp.float32).reshape(1, -1), 1, tn)

    mp, kp = xp.shape
    np_ = wp.shape[1]
    tp = jnp.pad(jnp.asarray(target, jnp.float32), ((0, mp - m), (0, np_ - n)))

    gi, gj, gk = mp // tm, np_ // tn, kp // tk
    kw = dict(m=m, n=n, tm=tm, tn=tn,
              mask_rows=(mp != m), mask_cols=(np_ != n))

    in_specs = [
        pl.BlockSpec((tm, tk), lambda i, j, k: (i, k)),
        pl.BlockSpec((tk, tn), lambda i, j, k: (k, j)),
        pl.BlockSpec((1, tn), lambda i, j, k: (0, j)),
        pl.BlockSpec((tm, tn), lambda i, j, k: (i, j)),
    ]
    part_spec = pl.BlockSpec((1, 1), lambda i, j, k: (i, j),
                             memory_space=pltpu.SMEM)
    compiler_params = pltpu.CompilerParams(
        dimension_semantics=("parallel", "parallel", "arbitrary"),
        vmem_limit_bytes=_vmem_limit_bytes(),
    )
    scratch = [pltpu.VMEM((tm, tn), jnp.float32)]

    if return_pred:
        kernel = functools.partial(_fused_pred_loss_kernel, **kw)
        out, part = pl.pallas_call(
            kernel,
            out_shape=(jax.ShapeDtypeStruct((mp, np_), out_dtype),
                       jax.ShapeDtypeStruct((gi, gj), jnp.float32)),
            grid=(gi, gj, gk),
            in_specs=in_specs,
            out_specs=(pl.BlockSpec((tm, tn), lambda i, j, k: (i, j)),
                       part_spec),
            scratch_shapes=scratch,
            compiler_params=compiler_params,
        )(xp, wp, bp, tp)
        loss = jnp.sum(part) / (m * n)
        return out[:m, :n], loss

    kernel = functools.partial(_fused_loss_only_kernel, **kw)
    part = pl.pallas_call(
        kernel,
        out_shape=jax.ShapeDtypeStruct((gi, gj), jnp.float32),
        grid=(gi, gj, gk),
        in_specs=in_specs,
        out_specs=part_spec,
        scratch_shapes=scratch,
        compiler_params=compiler_params,
    )(xp, wp, bp, tp)
    return jnp.sum(part) / (m * n)


# --------------------------------------------------------------------------
# Kernel 2: dense forward only (API-faithful `forward`)
# --------------------------------------------------------------------------
def _dense_kernel(x_ref, w_ref, b_ref, o_ref, acc_ref):
    @pl.when(pl.program_id(2) == 0)
    def _():
        acc_ref[...] = jnp.zeros_like(acc_ref)

    acc_ref[...] += jnp.dot(x_ref[...], w_ref[...],
                            preferred_element_type=jnp.float32)

    @pl.when(pl.program_id(2) == pl.num_programs(2) - 1)
    def _():
        o_ref[...] = (acc_ref[...] + b_ref[...]).astype(o_ref.dtype)


def dense_forward(x, w, b, *, n=None, tiles=None, out_dtype=jnp.float32):
    m, k_dim = x.shape
    if n is None:
        n = w.shape[1]
    tm, tk, tn = tiles if tiles is not None else _pick_tiles(m, k_dim, n)

    xp = _pad2d(jnp.asarray(x, jnp.bfloat16), tm, tk)
    wp = _pad2d(jnp.asarray(w, jnp.bfloat16), tk, tn)   # no-op if prepared
    bp = _pad2d(jnp.asarray(b, jnp.float32).reshape(1, -1), 1, tn)

    mp, kp = xp.shape
    np_ = wp.shape[1]

    out = pl.pallas_call(
        _dense_kernel,
        out_shape=jax.ShapeDtypeStruct((mp, np_), out_dtype),
        grid=(mp // tm, np_ // tn, kp // tk),
        in_specs=[
            pl.BlockSpec((tm, tk), lambda i, j, k: (i, k)),
            pl.BlockSpec((tk, tn), lambda i, j, k: (k, j)),
            pl.BlockSpec((1, tn), lambda i, j, k: (0, j)),
        ],
        out_specs=pl.BlockSpec((tm, tn), lambda i, j, k: (i, j)),
        scratch_shapes=[pltpu.VMEM((tm, tn), jnp.float32)],
        compiler_params=pltpu.CompilerParams(
            dimension_semantics=("parallel", "parallel", "arbitrary"),
            vmem_limit_bytes=_vmem_limit_bytes(),
        ),
    )(xp, wp, bp)
    return out[:m, :n]


# --------------------------------------------------------------------------
# Kernel 3: tiled MSE loss (API-faithful `calc_loss`), per-block partials
# --------------------------------------------------------------------------
def _mse_kernel(p_ref, t_ref, part_ref, *, m, n, tm, tn, mask_rows, mask_cols):
    i = pl.program_id(0)
    j = pl.program_id(1)
    d = p_ref[...].astype(jnp.float32) - t_ref[...].astype(jnp.float32)
    _partial_sq_sum(part_ref, d, i, j, m=m, n=n, tm=tm, tn=tn,
                    mask_rows=mask_rows, mask_cols=mask_cols)


def mse_loss(pred, target, *, tiles=None):
    m, n = pred.shape
    tm, tn = tiles if tiles is not None else _pick_mse_tiles(m, n)

    pp = _pad2d(jnp.asarray(pred, jnp.float32), tm, tn)
    tp = _pad2d(jnp.asarray(target, jnp.float32), tm, tn)
    mp, np_ = pp.shape
    gi, gj = mp // tm, np_ // tn

    kernel = functools.partial(_mse_kernel, m=m, n=n, tm=tm, tn=tn,
                               mask_rows=(mp != m), mask_cols=(np_ != n))
    part = pl.pallas_call(
        kernel,
        out_shape=jax.ShapeDtypeStruct((gi, gj), jnp.float32),
        grid=(gi, gj),
        in_specs=[
            pl.BlockSpec((tm, tn), lambda i, j: (i, j)),
            pl.BlockSpec((tm, tn), lambda i, j: (i, j)),
        ],
        out_specs=pl.BlockSpec((1, 1), lambda i, j: (i, j),
                               memory_space=pltpu.SMEM),
        compiler_params=pltpu.CompilerParams(
            dimension_semantics=("parallel", "parallel"),
            vmem_limit_bytes=_vmem_limit_bytes(),
        ),
    )(pp, tp)
    return jnp.sum(part) / (m * n)


# --------------------------------------------------------------------------
# JAX-side "Network" realization
# --------------------------------------------------------------------------
class PallasNetwork:
    """Minimal concrete realization of the abstract `Network` base class."""

    def __init__(self, args):
        self.args = args
        self.params = None
        self._wp = None
        self._bp = None
        self.d_out = None

    def build(self):
        d_in, d_out = self.args["d_in"], self.args["d_out"]
        kw, kb = jax.random.split(jax.random.PRNGKey(42))
        w = jax.random.normal(kw, (d_in, d_out), jnp.float32) * 0.02
        b = jax.random.normal(kb, (1, d_out), jnp.float32) * 0.02
        self.params = (w, b)
        # Pre-cast (bf16) + pre-pad parameters once: no per-call W cast/pad.
        self._wp, self._bp = prepare_params(w, b)
        self.d_out = d_out
        return self.params

    def forward(self, x, *, tiles=None):
        return dense_forward(x, self._wp, self._bp, n=self.d_out, tiles=tiles)

    def calc_loss(self, pred, target, *, tiles=None):
        return mse_loss(pred, target, tiles=tiles)

    def forward_with_loss(self, x, target, *, tiles=None, return_pred=True):
        """Fused forward + loss (single pallas_call, no pred round-trip)."""
        return forward_with_loss(x, self._wp, self._bp, target,
                                 tiles=tiles, return_pred=return_pred)


if __name__ == "__main__":
    # Small, deliberately non-tile-aligned shapes to exercise padding/masking.
    B, D_IN, D_OUT = 24, 384, 320

    net = PallasNetwork({"d_in": D_IN, "d_out": D_OUT})
    net.build()

    key = jax.random.PRNGKey(0)
    kx, kt = jax.random.split(key)
    x = jax.random.normal(kx, (B, D_IN), jnp.float32)
    target = jax.random.normal(kt, (B, D_OUT), jnp.float32)

    # Fused forward + loss with default (large) tiles -> single-block grid.
    pred, loss = net.forward_with_loss(x, target)
    # Fused with small tile override -> multi-block grid, edge masking,
    # parallel i/j with per-block partial-loss outputs.
    pred_s, loss_s = net.forward_with_loss(x, target, tiles=(16, 128, 128))
    # Loss-only fused path (no pred HBM writeback).
    loss_o = net.forward_with_loss(x, target, return_pred=False)
    # API-faithful unfused path.
    pred_u = net.forward(x)
    loss_u = net.calc_loss(pred_u, target, tiles=(8, 128))
    jax.block_until_ready((pred, loss, pred_s, loss_s, loss_o, pred_u, loss_u))

    # Plain-JAX reference (bf16 matmul inputs, f32 acc — same numerics).
    w, b = net.params
    ref_pred = jnp.dot(x.astype(jnp.bfloat16), w.astype(jnp.bfloat16),
                       preferred_element_type=jnp.float32) + b
    ref_loss = jnp.mean((ref_pred - target) ** 2)

    assert jnp.allclose(pred, ref_pred, atol=1e-2, rtol=1e-2)
    assert jnp.allclose(pred_s, ref_pred, atol=1e-2, rtol=1e-2)
    assert jnp.allclose(pred_u, ref_pred, atol=1e-2, rtol=1e-2)
    assert jnp.allclose(pred, pred_s, atol=1e-4, rtol=1e-4)
    assert jnp.allclose(loss, ref_loss, atol=1e-2, rtol=1e-2)
    assert jnp.allclose(loss_s, ref_loss, atol=1e-2, rtol=1e-2)
    assert jnp.allclose(loss_o, ref_loss, atol=1e-2, rtol=1e-2)
    assert jnp.allclose(loss_u, ref_loss, atol=1e-2, rtol=1e-2)

    print("KERNEL_OK")
</pallas_src>

<mosaic_0001>
module attributes {stable_mosaic.version = 11 : i64} {
  func.func @_fused_pred_loss_kernel(%arg0: i32, %arg1: i32, %arg2: i32, %arg3: memref<32x384xbf16, #tpu.memory_space<vmem>>, %arg4: memref<384x384xbf16, #tpu.memory_space<vmem>>, %arg5: memref<1x384xf32, #tpu.memory_space<vmem>>, %arg6: memref<32x384xf32, #tpu.memory_space<vmem>>, %arg7: memref<32x384xf32, #tpu.memory_space<vmem>>, %arg8: memref<1x1xf32, #tpu.memory_space<smem>>, %arg9: memref<32x384xf32, #tpu.memory_space<vmem>>) attributes {dimension_semantics = [#tpu.dimension_semantics<parallel>, #tpu.dimension_semantics<parallel>, #tpu.dimension_semantics<arbitrary>], iteration_bounds = array<i64: 1, 1, 1>, scalar_prefetch = 0 : i64, scratch_operands = 1 : i64, tpu.core_type = #tpu.core_type<tc>, window_params = [{transform_indices = @transform_0, window_bounds = array<i64: 32, 384>}, {transform_indices = @transform_1, window_bounds = array<i64: 384, 384>}, {transform_indices = @transform_2, window_bounds = array<i64: 1, 384>}, {transform_indices = @transform_3, window_bounds = array<i64: 32, 384>}, {transform_indices = @transform_4, window_bounds = array<i64: 32, 384>}, {transform_indices = @transform_5, window_bounds = array<i64: 1, 1>}]} {
    %c0_i32 = arith.constant 0 : i32
    %0 = arith.cmpi eq, %arg2, %c0_i32 : i32
    %1 = arith.extui %0 : i1 to i32
    %c0_i32_0 = arith.constant 0 : i32
    %2 = arith.cmpi ne, %1, %c0_i32_0 : i32
    scf.if %2 {
      %cst_10 = arith.constant 0.000000e+00 : f32
      %12 = vector.broadcast %cst_10 : f32 to vector<32x384xf32>
      %c0_11 = arith.constant 0 : index
      %c0_12 = arith.constant 0 : index
      %13 = vector.load %arg9[%c0_11, %c0_12] : memref<32x384xf32, #tpu.memory_space<vmem>>, vector<32x384xf32>
      tpu.vector_store %arg9[%c0_11, %c0_12], %12 {strides = array<i32>} : memref<32x384xf32, #tpu.memory_space<vmem>>, vector<32x384xf32>,
    } else {
    }
    %c0 = arith.constant 0 : index
    %c0_1 = arith.constant 0 : index
    %3 = vector.load %arg9[%c0, %c0_1] : memref<32x384xf32, #tpu.memory_space<vmem>>, vector<32x384xf32>
    %c0_2 = arith.constant 0 : index
    %c0_3 = arith.constant 0 : index
    %4 = vector.load %arg3[%c0_2, %c0_3] : memref<32x384xbf16, #tpu.memory_space<vmem>>, vector<32x384xbf16>
    %c0_4 = arith.constant 0 : index
    %c0_5 = arith.constant 0 : index
    %5 = vector.load %arg4[%c0_4, %c0_5] : memref<384x384xbf16, #tpu.memory_space<vmem>>, vector<384x384xbf16>
    %cst = arith.constant dense<0.000000e+00> : vector<32x384xf32>
    %6 = tpu.matmul %4, %5, %cst {dimension_numbers = #tpu.dot_dimension_numbers<[1], [0], [0], [1], [0, 0, 1, 1], [], []>} : vector<32x384xbf16>, vector<384x384xbf16>, vector<32x384xf32> -> vector<32x384xf32>
    %7 = arith.addf %3, %6 : vector<32x384xf32>
    %c0_6 = arith.constant 0 : index
    %c0_7 = arith.constant 0 : index
    %8 = vector.load %arg9[%c0_6, %c0_7] : memref<32x384xf32, #tpu.memory_space<vmem>>, vector<32x384xf32>
    tpu.vector_store %arg9[%c0_6, %c0_7], %7 {strides = array<i32>} : memref<32x384xf32, #tpu.memory_space<vmem>>, vector<32x384xf32>,
    %c0_i32_8 = arith.constant 0 : i32
    %9 = arith.cmpi eq, %arg2, %c0_i32_8 : i32
    %10 = arith.extui %9 : i1 to i32
    %c0_i32_9 = arith.constant 0 : i32
    %11 = arith.cmpi ne, %10, %c0_i32_9 : i32
    scf.if %11 {
      %c0_10 = arith.constant 0 : index
      %c0_11 = arith.constant 0 : index
      %12 = vector.load %arg9[%c0_10, %c0_11] : memref<32x384xf32, #tpu.memory_space<vmem>>, vector<32x384xf32>
      %c0_12 = arith.constant 0 : index
      %c0_13 = arith.constant 0 : index
      %13 = vector.load %arg5[%c0_12, %c0_13] : memref<1x384xf32, #tpu.memory_space<vmem>>, vector<1x384xf32>
      %14 = vector.broadcast %13 : vector<1x384xf32> to vector<32x384xf32>
      %15 = arith.addf %12, %14 : vector<32x384xf32>
      %c0_14 = arith.constant 0 : index
      %c0_15 = arith.constant 0 : index
      %16 = vector.load %arg7[%c0_14, %c0_15] : memref<32x384xf32, #tpu.memory_space<vmem>>, vector<32x384xf32>
      tpu.vector_store %arg7[%c0_14, %c0_15], %15 {strides = array<i32>} : memref<32x384xf32, #tpu.memory_space<vmem>>, vector<32x384xf32>,
      %c0_16 = arith.constant 0 : index
      %c0_17 = arith.constant 0 : index
      %17 = vector.load %arg6[%c0_16, %c0_17] : memref<32x384xf32, #tpu.memory_space<vmem>>, vector<32x384xf32>
      %18 = arith.subf %15, %17 : vector<32x384xf32>
      %c1_i32 = arith.constant 1 : i32
      %19 = arith.addi %arg0, %c1_i32 : i32
      %c32_i32 = arith.constant 32 : i32
      %20 = arith.muli %19, %c32_i32 : i32
      %c24_i32 = arith.constant 24 : i32
      %21 = arith.cmpi sgt, %20, %c24_i32 : i32
      %c1_i32_18 = arith.constant 1 : i32
      %22 = arith.addi %arg1, %c1_i32_18 : i32
      %c384_i32 = arith.constant 384 : i32
      %23 = arith.muli %22, %c384_i32 : i32
      %c320_i32 = arith.constant 320 : i32
      %24 = arith.cmpi sgt, %23, %c320_i32 : i32
      %25 = arith.ori %21, %24 : i1
      %26 = arith.extui %25 : i1 to i32
      %c0_i32_19 = arith.constant 0 : i32
      %27 = arith.cmpi ne, %26, %c0_i32_19 : i32
      scf.if %27 {
        %31 = tpu.iota {dimensions = array<i32: 0>} : vector<32x384xi32>
        %c32_i32_21 = arith.constant 32 : i32
        %32 = arith.muli %arg0, %c32_i32_21 : i32
        %33 = vector.broadcast %32 : i32 to vector<32x384xi32>
        %34 = arith.addi %31, %33 : vector<32x384xi32>
        %35 = tpu.iota {dimensions = array<i32: 1>} : vector<32x384xi32>
        %c384_i32_22 = arith.constant 384 : i32
        %36 = arith.muli %arg1, %c384_i32_22 : i32
        %37 = vector.broadcast %36 : i32 to vector<32x384xi32>
        %38 = arith.addi %35, %37 : vector<32x384xi32>
        %c24_i32_23 = arith.constant 24 : i32
        %39 = vector.broadcast %c24_i32_23 : i32 to vector<32x384xi32>
        %40 = arith.cmpi slt, %34, %39 : vector<32x384xi32>
        %c320_i32_24 = arith.constant 320 : i32
        %41 = vector.broadcast %c320_i32_24 : i32 to vector<32x384xi32>
        %42 = arith.cmpi slt, %38, %41 : vector<32x384xi32>
        %43 = arith.andi %40, %42 : vector<32x384xi1>
        %cst_25 = arith.constant 0.000000e+00 : f32
        %44 = vector.broadcast %cst_25 : f32 to vector<32x384xf32>
        %45 = arith.select %43, %18, %44 : vector<32x384xi1>, vector<32x384xf32>
        %46 = arith.mulf %45, %45 : vector<32x384xf32>
        %47 = vector.shape_cast %46 : vector<32x384xf32> to vector<1x32x384xf32>
        %cst_26 = arith.constant dense<0.000000e+00> : vector<1xf32>
        %48 = vector.multi_reduction <add>, %47, %cst_26 [1, 2] : vector<1x32x384xf32> to vector<1xf32>
        %49 = vector.shape_cast %48 : vector<1xf32> to vector<1x1x1xf32>
        %50 = vector.extract %49[0, 0, 0] : f32 from vector<1x1x1xf32>
        %c0_27 = arith.constant 0 : index
        %c0_28 = arith.constant 0 : index
        %51 = memref.load %arg8[%c0_27, %c0_28] : memref<1x1xf32, #tpu.memory_space<smem>>
        memref.store %50, %arg8[%c0_27, %c0_28] : memref<1x1xf32, #tpu.memory_space<smem>>
      } else {
      }
      %true = arith.constant true
      %28 = arith.xori %25, %true : i1
      %29 = arith.extui %28 : i1 to i32
      %c0_i32_20 = arith.constant 0 : i32
      %30 = arith.cmpi ne, %29, %c0_i32_20 : i32
      scf.if %30 {
        %31 = arith.mulf %18, %18 : vector<32x384xf32>
        %32 = vector.shape_cast %31 : vector<32x384xf32> to vector<1x32x384xf32>
        %cst_21 = arith.constant dense<0.000000e+00> : vector<1xf32>
        %33 = vector.multi_reduction <add>, %32, %cst_21 [1, 2] : vector<1x32x384xf32> to vector<1xf32>
        %34 = vector.shape_cast %33 : vector<1xf32> to vector<1x1x1xf32>
        %35 = vector.extract %34[0, 0, 0] : f32 from vector<1x1x1xf32>
        %c0_22 = arith.constant 0 : index
        %c0_23 = arith.constant 0 : index
        %36 = memref.load %arg8[%c0_22, %c0_23] : memref<1x1xf32, #tpu.memory_space<smem>>
        memref.store %35, %arg8[%c0_22, %c0_23] : memref<1x1xf32, #tpu.memory_space<smem>>
      } else {
      }
    } else {
    }
    return
  }
  func.func @transform_0(%arg0: i32, %arg1: i32, %arg2: i32) -> (i32, i32) {
    %c0_i32 = arith.constant 0 : i32
    return %arg0, %arg2 : i32, i32
  }
  func.func @transform_1(%arg0: i32, %arg1: i32, %arg2: i32) -> (i32, i32) {
    %c0_i32 = arith.constant 0 : i32
    return %arg2, %arg1 : i32, i32
  }
  func.func @transform_2(%arg0: i32, %arg1: i32, %arg2: i32) -> (i32, i32) {
    %c0_i32 = arith.constant 0 : i32
    %c0_i32_0 = arith.constant 0 : i32
    return %c0_i32, %arg1 : i32, i32
  }
  func.func @transform_3(%arg0: i32, %arg1: i32, %arg2: i32) -> (i32, i32) {
    %c0_i32 = arith.constant 0 : i32
    return %arg0, %arg1 : i32, i32
  }
  func.func @transform_4(%arg0: i32, %arg1: i32, %arg2: i32) -> (i32, i32) {
    %c0_i32 = arith.constant 0 : i32
    return %arg0, %arg1 : i32, i32
  }
  func.func @transform_5(%arg0: i32, %arg1: i32, %arg2: i32) -> (i32, i32) {
    %c0_i32 = arith.constant 0 : i32
    return %arg0, %arg1 : i32, i32
  }
}

</mosaic_0001>

<bundles_post_ra>
// kernel: tpu_custom_call.1
= control target key start
LH: loop header
LB: loop body
LE: loop exit
PB: predicated region body
PF: predicated region fallthrough
CT: control target
= control target key end

     0   :  { %11 = vsyncpa [#allocation4], 0  ;;  %s1577_s0 = inlined_call_operand.hbm [shape: bf16[32,384], index: 0, kind: input, shape index: {}]   ;;  %s1578_s1 = inlined_call_operand.hbm [shape: bf16[384,384], index: 1, kind: input, shape index: {}]   ;;  %s1579_s2 = inlined_call_operand.vmem [shape: f32[1,384], index: 2, kind: input, shape index: {}]   ;;  %s1580_s3 = inlined_call_operand.hbm [shape: f32[32,384], index: 3, kind: input, shape index: {}]   ;;  %s1581_s4 = inlined_call_operand.hbm [shape: f32[32,384], index: 4, kind: output, shape index: {0}]   ;;  %s1582_s5 = inlined_call_operand.hbm [shape: f32[1,1], index: 5, kind: output, shape index: {1}]  }
   0x1   :  { %12 = vsyncpa [#allocation8], 0 }
   0x2   :  { %13 = vsyncpa [#allocation5], 0 }
   0x3   :  { %14 = vsyncpa [#allocation6], 0  ;;  %s1448_s18 = smov [#allocation7]   ;;  %s1449_s20 = smov [#allocation3]  }
   0x4   :  { %s32_s19 = sshll.u32 %s1448_s18, 4  ;;  %s20_s21 = sshll.u32 %s1449_s20, 4  ;;  %s33_s19 = int_to_ptr.vmem [resolvable:$true] %s32_s19  ;;  %s1488_s21 = int_to_ptr.vmem [resolvable:$true] %s20_s21 }
   0x5   :  { %s1342_s24 = scalar_lea.hbm %s1578_s1, 9216 }
   0x6   :  { %p1343_p0 = scmp.ne.s32.totalorder %s1578_s1, %s1342_s24  ;;  %p1346_p1 = scmp.lt.u32.totalorder %s1342_s24, %s1578_s1 }
   0x8   :  { %p1348_p2 = pnand %p1346_p1, %p1343_p0 }
   0xa   :  { %1351 = shalt.err (!%p1348_p2)
}
   0xb   :  { %s1352_s29 = scalar_lea.vmem %s33_s19, 9216  ;;  %p1357_p4 = scmp.lt.s32.totalorder %s33_s19, %s33_s19 }
   0xc   :  { %p1353_p3 = scmp.ne.s32.totalorder %s33_s19, %s1352_s29  ;;  %p1358_p5 = scmp.lt.s32.totalorder %s1352_s29, %s1352_s29 }
   0xe   :  { %p1359_p6 = por %p1358_p5, %p1357_p4 }
  0x10   :  { %p1360_p7 = pnand %p1359_p6, %p1353_p3 }
  0x12   :  { %1363 = shalt.err (!%p1360_p7)
}
  0x13   :  { %s1450_s30 = smov 192   ;;  %s1451_s6 = smov 12  }
  0x14   :  { %38 = dma.hbm_to_vmem [thread:$0]  %s1578_s1, 9216, %s33_s19, [#allocation8], %s1450_s30, %s1450_s30, %s1451_s6  }
  0x15   :  { %s1364_s11 = scalar_lea.hbm %s1577_s0, 768 }
  0x16   :  { %p1365_p8 = scmp.ne.s32.totalorder %s1577_s0, %s1364_s11  ;;  %p1368_p9 = scmp.lt.u32.totalorder %s1364_s11, %s1577_s0 }
  0x18   :  { %p1370_p10 = pnand %p1368_p9, %p1365_p8 }
  0x1a   :  { %1373 = shalt.err (!%p1370_p10)
}
  0x1b   :  { %s1374_s16 = scalar_lea.vmem %s1488_s21, 768  ;;  %p1379_p12 = scmp.lt.s32.totalorder %s1488_s21, %s1488_s21 }
  0x1c   :  { %p1375_p11 = scmp.ne.s32.totalorder %s1488_s21, %s1374_s16  ;;  %p1380_p13 = scmp.lt.s32.totalorder %s1374_s16, %s1374_s16 }
  0x1e   :  { %p1381_p0 = por %p1380_p13, %p1379_p12 }
  0x20   :  { %p1382_p1 = pnand %p1381_p0, %p1375_p11 }
  0x22   :  { %1385 = shalt.err (!%p1382_p1)
}
  0x23   :  { %26 = dma.hbm_to_vmem [thread:$0]  %s1577_s0, 768, %s1488_s21, [#allocation4], %s1450_s30, %s1450_s30, %s1451_s6  }
  0x24   :  { %s1452_s18 = smov [#allocation9]   ;;  %s1386_s23 = scalar_lea.hbm %s1580_s3, 1536 }
  0x25   :  { %s46_s19 = sshll.u32 %s1452_s18, 4  ;;  %p1387_p2 = scmp.ne.s32.totalorder %s1580_s3, %s1386_s23  ;;  %s47_s19 = int_to_ptr.vmem [resolvable:$true] %s46_s19 }
  0x26   :  { %p1390_p3 = scmp.lt.u32.totalorder %s1386_s23, %s1580_s3 }
  0x28   :  { %p1392_p4 = pnand %p1390_p3, %p1387_p2 }
  0x2a   :  { %1395 = shalt.err (!%p1392_p4)
}
  0x2b   :  { %s1396_s28 = scalar_lea.vmem %s47_s19, 1536  ;;  %p1401_p6 = scmp.lt.s32.totalorder %s47_s19, %s47_s19 }
  0x2c   :  { %p1397_p5 = scmp.ne.s32.totalorder %s47_s19, %s1396_s28  ;;  %p1402_p7 = scmp.lt.s32.totalorder %s1396_s28, %s1396_s28 }
  0x2e   :  { %p1403_p8 = por %p1402_p7, %p1401_p6 }
  0x30   :  { %p1404_p9 = pnand %p1403_p8, %p1397_p5 }
  0x32   :  { %1407 = shalt.err (!%p1404_p9)
}
  0x33   :  { %s1453_s0 = smov 384   ;;  %s1454_s21 = smov 24  }
  0x34   :  { %52 = dma.hbm_to_vmem [thread:$0]  %s1580_s3, 1536, %s47_s19, [#allocation8], %s1453_s0, %s1453_s0, %s1454_s21  }
  0x35   :  { %1440 = dma.done.wait [#allocation4], 768  }
  0x36   :  { %1441 = vsyncadd [#allocation4], 4294966528 }
  0x37   :  { %1442 = dma.done.wait [#allocation8], 10752  }
  0x38   :  { %1443 = vsyncadd [#allocation8], 4294956544  ;;  %v1455_v0 = vmov 0   ;;  %v1238_v1 = vld [vmem:[#allocation7 + $0x4] ss:$12 sps:$4 sm:$0xff]  }
  0x39   :  { %696 = vmatprep.mubr.bf16.mxu1 %v1455_v0  ;;  %v1240_v2 = vld [vmem:[#allocation7 + $0x184] ss:$12 sps:$4 sm:$0xff]   ;;  %611 = vmatprep.subr.bf16.mxu0 %v1238_v1  ;;  %v1242_v3 = vld [vmem:[#allocation7] ss:$12 sps:$4 sm:$0xff]   ;;  %v1244_v5 = vld [vmem:[#allocation7 + $0x1c] ss:$12 sps:$4 sm:$0xff]  }
  0x3a   :  { %v1243_v4 = vld [vmem:[#allocation7 + $0x180] ss:$12 sps:$4 sm:$0xff]   ;;  %664 = vmatprep.subr.bf16.mxu1 %v1240_v2  ;;  %612 = vmatpush1.bf16.msra.mxu0 %v1242_v3  ;;  %v1246_v6 = vld [vmem:[#allocation7 + $0x19c] ss:$12 sps:$4 sm:$0xff]   ;;  %v1248_v7 = vld [vmem:[#allocation7 + $0x18] ss:$12 sps:$4 sm:$0xff]  }
  0x3b   :  { %665 = vmatpush1.bf16.msra.mxu1 %v1243_v4  ;;  %613 = vmatprep.subr.bf16.mxu0 %v1244_v5  ;;  %v1249_v8 = vld [vmem:[#allocation7 + $0x198] ss:$12 sps:$4 sm:$0xff]   ;;  %v1250_v9 = vld [vmem:[#allocation7 + $0x34] ss:$12 sps:$4 sm:$0xff]   ;;  %v1254_v11 = vld [vmem:[#allocation7 + $0x30] ss:$12 sps:$4 sm:$0xff]  }
  0x3c   :  { %666 = vmatprep.subr.bf16.mxu1 %v1246_v6  ;;  %v1252_v10 = vld [vmem:[#allocation7 + $0x1b4] ss:$12 sps:$4 sm:$0xff]   ;;  %v1255_v12 = vld [vmem:[#allocation7 + $0x1b0] ss:$12 sps:$4 sm:$0xff]   ;;  %v1256_v13 = vld [vmem:[#allocation7 + $0x4c] ss:$12 sps:$4 sm:$0xff]  }
  0x3d   :  { %v1258_v14 = vld [vmem:[#allocation7 + $0x1cc] ss:$12 sps:$4 sm:$0xff]   ;;  %v1260_v15 = vld [vmem:[#allocation7 + $0x48] ss:$12 sps:$4 sm:$0xff]   ;;  %v1262_v17 = vld [vmem:[#allocation7 + $0x64] ss:$12 sps:$4 sm:$0xff]  }
  0x3e   :  { %614 = vmatpush1.bf16.msra.mxu0 %v1248_v7  ;;  %v1261_v16 = vld [vmem:[#allocation7 + $0x1c8] ss:$12 sps:$4 sm:$0xff]   ;;  %v1264_v18 = vld [vmem:[#allocation7 + $0x1e4] ss:$12 sps:$4 sm:$0xff]   ;;  %v1266_v19 = vld [vmem:[#allocation7 + $0x60] ss:$12 sps:$4 sm:$0xff]  }
  0x3f   :  { %667 = vmatpush1.bf16.msra.mxu1 %v1249_v8  ;;  %615 = vmatprep.subr.bf16.mxu0 %v1250_v9  ;;  %v1267_v20 = vld [vmem:[#allocation7 + $0x1e0] ss:$12 sps:$4 sm:$0xff]   ;;  %v1268_v21 = vld [vmem:[#allocation7 + $0x7c] ss:$12 sps:$4 sm:$0xff]   ;;  %v1272_v23 = vld [vmem:[#allocation7 + $0x78] ss:$12 sps:$4 sm:$0xff]  }
  0x40   :  { %668 = vmatprep.subr.bf16.mxu1 %v1252_v10  ;;  %v1270_v22 = vld [vmem:[#allocation7 + $0x1fc] ss:$12 sps:$4 sm:$0xff]   ;;  %v1273_v24 = vld [vmem:[#allocation7 + $0x1f8] ss:$12 sps:$4 sm:$0xff]   ;;  %v1274_v25 = vld [vmem:[#allocation7 + $0x94] ss:$12 sps:$4 sm:$0xff]  }
  0x41   :  { %v1276_v26 = vld [vmem:[#allocation7 + $0x214] ss:$12 sps:$4 sm:$0xff]   ;;  %v1278_v27 = vld [vmem:[#allocation7 + $0x90] ss:$12 sps:$4 sm:$0xff]   ;;  %v1280_v29 = vld [vmem:[#allocation7 + $0xac] ss:$12 sps:$4 sm:$0xff]  }
  0x42   :  { %616 = vmatpush1.bf16.msra.mxu0 %v1254_v11  ;;  %v1279_v28 = vld [vmem:[#allocation7 + $0x210] ss:$12 sps:$4 sm:$0xff]   ;;  %v1282_v30 = vld [vmem:[#allocation7 + $0x22c] ss:$12 sps:$4 sm:$0xff]   ;;  %v1284_v31 = vld [vmem:[#allocation7 + $0xa8] ss:$12 sps:$4 sm:$0xff]  }
  0x43   :  { %669 = vmatpush1.bf16.msra.mxu1 %v1255_v12  ;;  %617 = vmatprep.subr.bf16.mxu0 %v1256_v13  ;;  %v1285_v32 = vld [vmem:[#allocation7 + $0x228] ss:$12 sps:$4 sm:$0xff]   ;;  %v1286_v33 = vld [vmem:[#allocation7 + $0xc4] ss:$12 sps:$4 sm:$0xff]   ;;  %v1290_v36 = vld [vmem:[#allocation7 + $0xc0] ss:$12 sps:$4 sm:$0xff]  }
  0x44   :  { %670 = vmatprep.subr.bf16.mxu1 %v1258_v14  ;;  %v1535_v34 = vld [vmem:[#allocation3 + $0x8] ss:$12 sps:$4 sm:$0xff]   ;;  %v1289_v35 = vld [vmem:[#allocation7 + $0xc8] ss:$12 sps:$4 sm:$0xff]   ;;  %v1294_v39 = vld [vmem:[#allocation7 + $0xe0] ss:$12 sps:$4 sm:$0xff]  }
  0x45   :  { %v1291_v37 = vld [vmem:[#allocation7 + $0x8] ss:$12 sps:$4 sm:$0xff]   ;;  %v1295_v40 = vld [vmem:[#allocation7 + $0xd8] ss:$12 sps:$4 sm:$0xff]   ;;  %v1296_v41 = vld [vmem:[#allocation7 + $0x20] ss:$12 sps:$4 sm:$0xff]  }
  0x46   :  { %618 = vmatpush1.bf16.msra.mxu0 %v1260_v15  ;;  %v1292_v38 = vld [vmem:[#allocation7 + $0xdc] ss:$12 sps:$4 sm:$0xff]   ;;  %v1297_v42 = vld [vmem:[#allocation7 + $0xf4] ss:$12 sps:$4 sm:$0xff]   ;;  %v1299_v43 = vld [vmem:[#allocation7 + $0xf8] ss:$12 sps:$4 sm:$0xff]  }
  0x47   :  { %671 = vmatpush1.bf16.msra.mxu1 %v1261_v16  ;;  %619 = vmatprep.subr.bf16.mxu0 %v1262_v17  ;;  %v1300_v44 = vld [vmem:[#allocation7 + $0xf0] ss:$12 sps:$4 sm:$0xff]   ;;  %v1301_v45 = vld [vmem:[#allocation7 + $0x38] ss:$12 sps:$4 sm:$0xff]   ;;  %v1305_v48 = vld [vmem:[#allocation7 + $0x108] ss:$12 sps:$4 sm:$0xff]  }
  0x48   :  { %672 = vmatprep.subr.bf16.mxu1 %v1264_v18  ;;  %v1302_v46 = vld [vmem:[#allocation7 + $0x10c] ss:$12 sps:$4 sm:$0xff]   ;;  %v1304_v47 = vld [vmem:[#allocation7 + $0x110] ss:$12 sps:$4 sm:$0xff]   ;;  %v1309_v52 = vld [vmem:[#allocation7 + $0x128] ss:$12 sps:$4 sm:$0xff]  }
  0x49   :  { %v1539_v49 = vld [vmem:[#allocation3 + $0x20] ss:$12 sps:$4 sm:$0xff]   ;;  %v1310_v53 = vld [vmem:[#allocation7 + $0x120] ss:$12 sps:$4 sm:$0xff]   ;;  %v1311_v54 = vld [vmem:[#allocation7 + $0x68] ss:$12 sps:$4 sm:$0xff]  }
  0x4a   :  { %620 = vmatpush1.bf16.msra.mxu0 %v1266_v19  ;;  %v1306_v50 = vld [vmem:[#allocation7 + $0x50] ss:$12 sps:$4 sm:$0xff]   ;;  %v1314_v56 = vld [vmem:[#allocation7 + $0x140] ss:$12 sps:$4 sm:$0xff]   ;;  %v1315_v57 = vld [vmem:[#allocation7 + $0x138] ss:$12 sps:$4 sm:$0xff]  }
  0x4b   :  { %673 = vmatpush1.bf16.msra.mxu1 %v1267_v20  ;;  %621 = vmatprep.subr.bf16.mxu0 %v1268_v21  ;;  %v1307_v51 = vld [vmem:[#allocation7 + $0x124] ss:$12 sps:$4 sm:$0xff]   ;;  %v1312_v55 = vld [vmem:[#allocation7 + $0x13c] ss:$12 sps:$4 sm:$0xff]   ;;  %v1316_v58 = vld [vmem:[#allocation7 + $0x80] ss:$12 sps:$4 sm:$0xff]  }
  0x4c   :  { %674 = vmatprep.subr.bf16.mxu1 %v1270_v22  ;;  %v1330_v59 = vld [vmem:[#allocation3 + $0x4] ss:$12 sps:$4 sm:$0xff]   ;;  %v1320_v61 = vld [vmem:[#allocation7 + $0x158] ss:$12 sps:$4 sm:$0xff]   ;;  %v1321_v62 = vld [vmem:[#allocation7 + $0x150] ss:$12 sps:$4 sm:$0xff]  }
  0x4d   :  { %v1318_v60 = vld [vmem:[#allocation7 + $0x154] ss:$12 sps:$4 sm:$0xff]   ;;  %643 = vmatprep.mubr.bf16.mxu0 %v1330_v59  ;;  %v1322_v63 = vld [vmem:[#allocation7 + $0x98] ss:$12 sps:$4 sm:$0xff]   ;;  %v1325_v1 = vld [vmem:[#allocation7 + $0x170] ss:$12 sps:$4 sm:$0xff]  }
  0x4e   :  { %622 = vmatpush1.bf16.msra.mxu0 %v1272_v23  ;;  %v1326_v2 = vld [vmem:[#allocation7 + $0x168] ss:$12 sps:$4 sm:$0xff]   ;;  %v1327_v3 = vld [vmem:[#allocation7 + $0xb0] ss:$12 sps:$4 sm:$0xff]   ;;  %v1333_v6 = vld [vmem:[#allocation3 + $0x1c] ss:$12 sps:$4 sm:$0xff]   ;;  %v856_v23 = vlaneseq }
  0x4f   :  { %675 = vmatpush1.bf16.msra.mxu1 %v1273_v24  ;;  %623 = vmatprep.subr.bf16.mxu0 %v1274_v25  ;;  %v1331_v4 = vld [vmem:[#allocation7 + $0x188] ss:$12 sps:$4 sm:$0xff]   ;;  %v1328_v5 = vld [vmem:[#allocation3] ss:$12 sps:$4 sm:$0xff]   ;;  %v1332_v7 = vld [vmem:[#allocation7 + $0x1a0] ss:$12 sps:$4 sm:$0xff]  }
  0x50   :  { %676 = vmatprep.subr.bf16.mxu1 %v1276_v26  ;;  %v1336_v8 = vld [vmem:[#allocation7 + $0x1b8] ss:$12 sps:$4 sm:$0xff]   ;;  %v1335_v9 = vld [vmem:[#allocation3 + $0x18] ss:$12 sps:$4 sm:$0xff]   ;;  %v1337_v10 = vld [vmem:[#allocation7 + $0x1d0] ss:$12 sps:$4 sm:$0xff]  }
  0x51   :  { %v1338_v11 = vld [vmem:[#allocation7 + $0x1e8] ss:$12 sps:$4 sm:$0xff]   ;;  %v1339_v12 = vld [vmem:[#allocation7 + $0x200] ss:$12 sps:$4 sm:$0xff]   ;;  %v1340_v13 = vld [vmem:[#allocation7 + $0x218] ss:$12 sps:$4 sm:$0xff]  }
  0x52   :  { %624 = vmatpush1.bf16.msra.mxu0 %v1278_v27  ;;  %v1341_v14 = vld [vmem:[#allocation7 + $0x230] ss:$12 sps:$4 sm:$0xff]   ;;  %v857_v24 = vshrl.u32 %v856_v23, 7 }
  0x53   :  { %677 = vmatpush1.bf16.msra.mxu1 %v1279_v28  ;;  %625 = vmatprep.subr.bf16.mxu0 %v1280_v29  ;;  %v854_v26 = vld [vmem:[%s1579_s2] sm:$0x7]  ;;  %s1456_s2 = smov [#allocation10]  }
  0x54   :  { %678 = vmatprep.subr.bf16.mxu1 %v1282_v30  ;;  %v858_v25 = vsub.s32 0, %v857_v24  ;;  %v862_v27 = vsub.s32 1, %v857_v24  ;;  %s1056_s7 = sshll.u32 %s1456_s2, 4  ;;  %s1057_s7 = int_to_ptr.vmem [resolvable:$true] %s1056_s7 }
  0x55   :  { %s1408_s8 = scalar_lea.vmem %s1057_s7, 1536  ;;  %p1413_p11 = scmp.lt.s32.totalorder %s1057_s7, %s1057_s7 }
  0x56   :  { %626 = vmatpush1.bf16.msra.mxu0 %v1284_v31  ;;  %v859_v28 = vrot.slane %v854_v26, %v858_v25  ;;  %v863_v31 = vrot.slane %v854_v26, %v862_v27  ;;  %p1409_p10 = scmp.ne.s32.totalorder %s1057_s7, %s1408_s8  ;;  %p1414_p12 = scmp.lt.s32.totalorder %s1408_s8, %s1408_s8 }
  0x57   :  { %679 = vmatpush1.bf16.msra.mxu1 %v1285_v32  ;;  %627 = vmatprep.subr.bf16.mxu0 %v1286_v33 }
  0x58   :  { %1160 = vmatprep.subr.bf16.mxu1 %v1289_v35  ;;  %v895_v35 = vld [vmem:[#allocation9] sm:$0xff]  ;;  %p1415_p13 = por %p1414_p12, %p1413_p11 }
  0x5a   :  { %697 = vmatmul.mubr.bf16.vlgmr.msra.gmra.mrb[0].mxu1 %v1535_v34  ;;  %628 = vmatpush1.bf16.msra.mxu0 %v1290_v36  ;;  %p1416_p0 = pnand %p1415_p13, %p1409_p10 }
  0x5b   :  { %1161 = vmatpush3.bf16.msra.mxu1 %v1291_v37  ;;  %629 = vmatprep.subr.bf16.mxu0 %v1292_v38 }
  0x5c   :  { %1162 = vmatprep.subr.bf16.mxu1 %v1294_v39  ;;  %706 = vmatprep.mubr.bf16.mxu1 %v1455_v0  ;;  %v1323_v0 = vld [vmem:[#allocation7 + $0x16c] ss:$12 sps:$4 sm:$0xff]  }
  0x5e   :  { %630 = vmatpush1.bf16.msra.mxu0 %v1295_v40 }
  0x5f   :  { %1163 = vmatpush3.bf16.msra.mxu1 %v1296_v41  ;;  %631 = vmatprep.subr.bf16.mxu0 %v1297_v42  ;;  %v896_v41 = vld [vmem:[#allocation9 + $0x8] sm:$0xff] }
  0x60   :  { %1164 = vmatprep.subr.bf16.mxu1 %v1299_v43 }
  0x62   :  { %632 = vmatpush1.bf16.msra.mxu0 %v1300_v44  ;;  %707 = vmatmul.mubr.bf16.gmra.mrb[4].mxu1 %v1539_v49 }
  0x63   :  { %1165 = vmatpush3.bf16.msra.mxu1 %v1301_v45  ;;  %633 = vmatprep.subr.bf16.mxu0 %v1302_v46 }
  0x64   :  { %1166 = vmatprep.subr.bf16.mxu1 %v1304_v47  ;;  %749 = vmatprep.mubr.bf16.mxu1 %v1330_v59 }
  0x66   :  { %634 = vmatpush1.bf16.msra.mxu0 %v1305_v48 }
  0x67   :  { %1167 = vmatpush3.bf16.msra.mxu1 %v1306_v50  ;;  %635 = vmatprep.subr.bf16.mxu0 %v1307_v51 }
  0x68   :  { %1168 = vmatprep.subr.bf16.mxu1 %v1309_v52 }
  0x6a   :  { %636 = vmatpush1.bf16.msra.mxu0 %v1310_v53 }
  0x6b   :  { %1169 = vmatpush3.bf16.msra.mxu1 %v1311_v54  ;;  %637 = vmatprep.subr.bf16.mxu0 %v1312_v55 }
  0x6c   :  { %1170 = vmatprep.subr.bf16.mxu1 %v1314_v56 }
  0x6e   :  { %638 = vmatpush1.bf16.msra.mxu0 %v1315_v57 }
  0x6f   :  { %1171 = vmatpush3.bf16.msra.mxu1 %v1316_v58  ;;  %639 = vmatprep.subr.bf16.mxu0 %v1318_v60 }
  0x70   :  { %1172 = vmatprep.subr.bf16.mxu1 %v1320_v61 }
  0x72   :  { %640 = vmatpush1.bf16.msra.mxu0 %v1321_v62 }
  0x73   :  { %1173 = vmatpush3.bf16.msra.mxu1 %v1322_v63  ;;  %641 = vmatprep.subr.bf16.mxu0 %v1323_v0 }
  0x74   :  { %1174 = vmatprep.subr.bf16.mxu1 %v1325_v1 }
  0x76   :  { %642 = vmatpush1.bf16.msra.mxu0 %v1326_v2 }
  0x77   :  { %1175 = vmatpush3.bf16.msra.mxu1 %v1327_v3 }
  0x78   :  { %1198 = vmatprep.subr.bf16.mxu1 %v1331_v4 }
  0x79   :  { %644 = vmatmul.mubr.bf16.vlgmr.msra.gmra.mrb[0].mxu0 %v1328_v5 }
  0x7a   :  { %750 = vmatmul.mubr.bf16.vlgmr.msra.gmra.mrb[8].mxu1 %v1328_v5  ;;  %653 = vmatprep.mubr.bf16.mxu0 %v1333_v6 }
  0x7b   :  { %1199 = vmatpush3.bf16.msra.mxu1 %v1331_v4  ;;  %757 = vmatprep.mubr.bf16.mxu1 %v1333_v6 }
  0x7c   :  { %1200 = vmatprep.subr.bf16.mxu1 %v1332_v7 }
  0x7f   :  { %1201 = vmatpush3.bf16.msra.mxu1 %v1332_v7 }
  0x80   :  { %1202 = vmatprep.subr.bf16.mxu1 %v1336_v8 }
  0x81   :  { %654 = vmatmul.mubr.bf16.gmra.mrb[4].mxu0 %v1335_v9 }
  0x82   :  { %758 = vmatmul.mubr.bf16.gmra.mrb[12].mxu1 %v1335_v9  ;;  %v866_v9 = vsub.s32 2, %v857_v24  ;;  %v899_v24 = vld [vmem:[#allocation9 + $0x20] sm:$0xff] }
  0x83   :  { %1203 = vmatpush3.bf16.msra.mxu1 %v1336_v8  ;;  %1214 = vmatprep.mubr.bf16.mxu1 %v1535_v34 }
  0x84   :  { %1204 = vmatprep.subr.bf16.mxu1 %v1337_v10 }
  0x87   :  { %1205 = vmatpush3.bf16.msra.mxu1 %v1337_v10  ;;  %v941_v10 = vand.u32 127, %v856_v23 }
  0x88   :  { %1206 = vmatprep.subr.bf16.mxu1 %v1338_v11 }
  0x8b   :  { %1207 = vmatpush3.bf16.msra.mxu1 %v1338_v11  ;;  %v867_v11 = vrot.slane %v854_v26, %v866_v9 }
  0x8c   :  { %1208 = vmatprep.subr.bf16.mxu1 %v1339_v12 }
  0x8f   :  { %1209 = vmatpush3.bf16.msra.mxu1 %v1339_v12 }
  0x90   :  { %1210 = vmatprep.subr.bf16.mxu1 %v1340_v13 }
  0x93   :  { %1211 = vmatpush3.bf16.msra.mxu1 %v1340_v13 }
  0x94   :  { %1212 = vmatprep.subr.bf16.mxu1 %v1341_v14 }
  0x97   :  { %1213 = vmatpush3.bf16.msra.mxu1 %v1341_v14 }
  0x9a   :  { %1215 = vmatmul.mubr.bf16.vlgmr.msra.gmra.mrb[16].mxu1 %v1539_v49 }
 0x12d   :  { %v698_v15 = vpop.f32.mrb[0].mxu1 }
 0x12e   :  { %v700_v16 = vpop.f32.mrb[1].mxu1 }
 0x12f   :  { %v702_v17 = vpop.f32.mrb[2].mxu1 }
 0x130   :  { %v704_v18 = vpop.f32.mrb[3].mxu1 }
 0x135   :  { %v708_v19 = vpop.f32.mrb[4].mxu1 }
 0x136   :  { %v710_v20 = vpop.f32.mrb[5].mxu1 }
 0x137   :  { %v712_v21 = vpop.f32.mrb[6].mxu1 }
 0x138   :  { %v714_v22 = vpop.f32.mrb[7].mxu1 }
 0x14c   :  { %v645_v29 = vpop.f32.mrb[0].mxu0 }
 0x14d   :  { %v1176_v30 = vpop.f32.mrb[8].mxu1  ;;  %v699_v32 = vadd.f32 %v698_v15, %v645_v29  ;;  %v647_v33 = vpop.f32.mrb[1].mxu0  ;;  %v943_v15 = vadd.s32 256, %v941_v10  ;;  %v900_v29 = vld [vmem:[#allocation9 + $0x28] sm:$0xff] }
 0x14e   :  { %v1177_v34 = vpop.f32.mrb[9].mxu1  ;;  %v701_v36 = vadd.f32 %v700_v16, %v647_v33  ;;  %v649_v38 = vpop.f32.mrb[2].mxu0 }
 0x14f   :  { %v1178_v37 = vadd.f32 %v1177_v34, %v1176_v30  ;;  %v1179_v39 = vpop.f32.mrb[10].mxu1  ;;  %v871_v40 = vadd.f32 %v859_v28, %v699_v32  ;;  %v703_v42 = vadd.f32 %v702_v17, %v649_v38  ;;  %v651_v43 = vpop.f32.mrb[3].mxu0  ;;  %vm955_vm0 = vcmp.lt.s32.totalorder %v943_v15, 320 }
 0x150   :  { %v1180_v44 = vpop.f32.mrb[11].mxu1  ;;  %v872_v45 = vadd.f32 %v863_v31, %v701_v36  ;;  %v705_v46 = vadd.f32 %v704_v18, %v651_v43 }
 0x151   :  { %v1181_v47 = vadd.f32 %v1180_v44, %v1179_v39  ;;  %883 = vst [vmem:[#allocation10] sm:$0xff] %v871_v40  ;;  %v907_v48 = vsub.f32 %v871_v40, %v895_v35  ;;  %v874_v49 = vadd.f32 %v859_v28, %v703_v42  ;;  %v901_v35 = vld [vmem:[#allocation9 + $0x30] sm:$0xff]  ;;  %v902_v39 = vld [vmem:[#allocation9 + $0x38] sm:$0xff] }
 0x152   :  { %884 = vst [vmem:[#allocation10 + $0x8] sm:$0xff] %v872_v45  ;;  %v908_v50 = vsub.f32 %v872_v45, %v896_v41  ;;  %v875_v51 = vadd.f32 %v863_v31, %v705_v46 }
 0x153   :  { %v980_v52 = vmul.f32 %v907_v48, %v907_v48  ;;  %886 = vst [vmem:[#allocation10 + $0x18] sm:$0xff] %v874_v49 }
 0x154   :  { %v981_v53 = vmul.f32 %v908_v50, %v908_v50  ;;  %887 = vst [vmem:[#allocation10 + $0x20] sm:$0xff] %v875_v51  ;;  %v655_v54 = vpop.f32.mrb[4].mxu0  ;;  %v911_v33 = vsub.f32 %v875_v51, %v899_v24 }
 0x155   :  { %v1182_v55 = vpop.f32.mrb[12].mxu1  ;;  %v709_v56 = vadd.f32 %v708_v19, %v655_v54  ;;  %v657_v57 = vpop.f32.mrb[5].mxu0  ;;  %v897_v19 = vld [vmem:[#allocation9 + $0x10] sm:$0xff] }
 0x156   :  { %v1183_v58 = vpop.f32.mrb[13].mxu1  ;;  %v992_v59 = vadd.f32 %v981_v53, %v980_v52  ;;  %v711_v60 = vadd.f32 %v710_v20, %v657_v57  ;;  %v659_v61 = vpop.f32.mrb[6].mxu0  ;;  %v984_v41 = vmul.f32 %v911_v33, %v911_v33 }
 0x157   :  { %v1184_v62 = vadd.f32 %v1183_v58, %v1182_v55  ;;  %v1185_v63 = vpop.f32.mrb[14].mxu1  ;;  %v877_v0 = vadd.f32 %v859_v28, %v709_v56  ;;  %v713_v1 = vadd.f32 %v712_v21, %v659_v61  ;;  %v661_v2 = vpop.f32.mrb[7].mxu0 }
 0x158   :  { %v1186_v3 = vpop.f32.mrb[15].mxu1  ;;  %v878_v4 = vadd.f32 %v863_v31, %v711_v60  ;;  %v715_v5 = vadd.f32 %v714_v22, %v661_v2  ;;  %v898_v22 = vld [vmem:[#allocation9 + $0x18] sm:$0xff] }
 0x159   :  { %v1187_v6 = vadd.f32 %v1186_v3, %v1185_v63  ;;  %889 = vst [vmem:[#allocation10 + $0x30] sm:$0xff] %v877_v0  ;;  %v880_v7 = vadd.f32 %v859_v28, %v713_v1  ;;  %v910_v30 = vsub.f32 %v874_v49, %v898_v22  ;;  %v913_v42 = vsub.f32 %v877_v0, %v901_v35 }
 0x15a   :  { %890 = vst [vmem:[#allocation10 + $0x38] sm:$0xff] %v878_v4  ;;  %v881_v8 = vadd.f32 %v863_v31, %v715_v5  ;;  %v914_v45 = vsub.f32 %v878_v4, %v902_v39 }
 0x15b   :  { %892 = vst [vmem:[#allocation10 + $0x48] sm:$0xff] %v880_v7  ;;  %v983_v36 = vmul.f32 %v910_v30, %v910_v30  ;;  %v986_v48 = vmul.f32 %v913_v42, %v913_v42 }
 0x15c   :  { %893 = vst [vmem:[#allocation10 + $0x50] sm:$0xff] %v881_v8  ;;  %v987_v51 = vmul.f32 %v914_v45, %v914_v45 }
 0x16d   :  { %v1216_v12 = vpop.f32.mrb[16].mxu1 }
 0x16e   :  { %v809_v13 = vadd.f32 %v1216_v12, %v1184_v62  ;;  %v800_v14 = vpop.f32.mrb[17].mxu1 }
 0x16f   :  { %v801_v16 = vadd.f32 %v1178_v37, %v800_v14  ;;  %v1217_v17 = vpop.f32.mrb[18].mxu1  ;;  %v903_v37 = vld [vmem:[#allocation9 + $0x40] sm:$0xff] }
 0x170   :  { %v879_v18 = vadd.f32 %v867_v11, %v809_v13  ;;  %v812_v20 = vadd.f32 %v1217_v17, %v1187_v6  ;;  %v803_v21 = vpop.f32.mrb[19].mxu1 }
 0x171   :  { %v873_v25 = vadd.f32 %v867_v11, %v801_v16  ;;  %v804_v27 = vadd.f32 %v1181_v47, %v803_v21 }
 0x172   :  { %891 = vst [vmem:[#allocation10 + $0x40] sm:$0xff] %v879_v18  ;;  %v882_v28 = vadd.f32 %v867_v11, %v812_v20  ;;  %v915_v44 = vsub.f32 %v879_v18, %v903_v37 }
 0x173   :  { %885 = vst [vmem:[#allocation10 + $0x10] sm:$0xff] %v873_v25  ;;  %v909_v23 = vsub.f32 %v873_v25, %v897_v19  ;;  %v876_v26 = vadd.f32 %v867_v11, %v804_v27 }
 0x174   :  { %894 = vst [vmem:[#allocation10 + $0x58] sm:$0xff] %v882_v28  ;;  %v976_v50 = vsel %vm955_vm0, %v915_v44, 0.0 }
 0x175   :  { %888 = vst [vmem:[#allocation10 + $0x28] sm:$0xff] %v876_v26  ;;  %v912_v31 = vsub.f32 %v876_v26, %v900_v29  ;;  %v970_v32 = vsel %vm955_vm0, %v909_v23, 0.0  ;;  %v988_v53 = vmul.f32 %v976_v50, %v976_v50 }
 0x176   :  { %v982_v34 = vmul.f32 %v970_v32, %v970_v32 }
 0x177   :  { %v973_v40 = vsel %vm955_vm0, %v912_v31, 0.0 }
 0x178   :  { %v993_v38 = vadd.f32 %v992_v59, %v982_v34  ;;  %v985_v46 = vmul.f32 %v973_v40, %v973_v40 }
 0x17a   :  { %v994_v43 = vadd.f32 %v993_v38, %v983_v36 }
 0x17c   :  { %v995_v47 = vadd.f32 %v994_v43, %v984_v41 }
 0x17e   :  { %v996_v49 = vadd.f32 %v995_v47, %v985_v46 }
 0x180   :  { %v997_v52 = vadd.f32 %v996_v49, %v986_v48 }
 0x182   :  { %v998_v54 = vadd.f32 %v997_v52, %v987_v51 }
 0x184   :  { %v999_v55 = vadd.f32 %v998_v54, %v988_v53 }
 0x186   :  { %1003 = vadd.xlane.f32.xlu0 %v999_v55 }
 0x187   :  { %1419 = shalt.err (!%p1416_p0)
}
 0x188   :  { %s1420_s11 = scalar_lea.hbm %s1581_s4, 1536 }
 0x189   :  { %p1421_p1 = scmp.ne.s32.totalorder %s1581_s4, %s1420_s11  ;;  %p1424_p2 = scmp.lt.u32.totalorder %s1420_s11, %s1581_s4 }
 0x18b   :  { %p1426_p3 = pnand %p1424_p2, %p1421_p1 }
 0x18d   :  { %1429 = shalt.err (!%p1426_p3)
}
 0x18e   :  { %1062 = dma.vmem_to_hbm [thread:$0]  %s1057_s7, 1536, %s1581_s4, [#allocation5], %s1453_s0, %s1453_s0, %s1454_s21  }
 0x18f   :  { %s1430_s20 = scalar_lea.hbm %s1582_s5, 16 }
 0x190   :  { %p1431_p4 = scmp.ne.s32.totalorder %s1582_s5, %s1430_s20  ;;  %p1434_p5 = scmp.lt.u32.totalorder %s1430_s20, %s1582_s5 }
 0x192   :  { %p1436_p6 = pnand %p1434_p5, %p1431_p4 }
 0x213   :  { %v1004_v56 = vpop.xlane.xlu0 %1003 }
 0x214   :  { %v1005_v57 = vrot.slane %v1004_v56, 4 }
 0x216   :  { %v1006_v58 = vadd.f32 %v1005_v57, %v1004_v56 }
 0x218   :  { %v1007_v59 = vrot.slane %v1006_v58, 2 }
 0x21a   :  { %v1008_v60 = vadd.f32 %v1007_v59, %v1006_v58 }
 0x21c   :  { %v1009_v61 = vrot.slane %v1008_v60, 1 }
 0x21e   :  { %v1010_v62 = vadd.f32 %v1009_v61, %v1008_v60 }
 0x220   :  { %1226 = vpush %v1010_v62 }
 0x251   :  { %s1227_s17 = spop %1226 }
 0x252   :  { %1013 = sst [smem:[#allocation11]] %s1227_s17 }
 0x253   :  { %1439 = shalt.err (!%p1436_p6)
}
 0x254   :  { %s1457_s25 = smov [#allocation11]  }
 0x255   :  { %1070 = dma.smem_to_hbm %s1457_s25, 16, %s1582_s5, [#allocation6]  }
 0x256   :  { %1444 = dma.done.wait [#allocation5], 1536  }
 0x257   :  { %1445 = vsyncadd [#allocation5], 4294965760 }
 0x258   :  { %1446 = dma.done.wait [#allocation6], 16  }
 0x259   :  { %1447 = vsyncadd [#allocation6], 4294967280 }
 0x25a   :  { %1077 = sfence }
 0x25b   :  { %1078 = vsyncpa [#allocation4], 1 }
 0x25c   :  { %1079 = vsyncpa [#allocation8], 1 }
 0x25d   :  { %1080 = vsyncpa [#allocation5], 1 }
 0x25e   :  { %1081 = vsyncpa [#allocation6], 1 }

</bundles_post_ra>
